<compile_context>
chip_gen: v7x
topology: tpu7x:2x2x1
jax: 0.10.0
libtpu: 0.0.40
codegen_flags: <defaults>
</compile_context>

<pallas_src>
import functools

import jax
import jax.numpy as jnp
from jax.experimental import pallas as pl
from jax.experimental.pallas import tpu as pltpu


# ----------------------------------------------------------------------------
# Pallas kernel: fused two-branch MLP on one batch tile.
# ----------------------------------------------------------------------------
def _mlp_fused_kernel(
    x_ref,                      # [TB, D]    bf16 (streamed per grid step)
    w1_ref, b1_ref,             # [D, 2H] bf16, [1, 2H] f32   (actor | critic concatenated)
    w2_ref, b2_ref,             # [2H, 2H] bf16, [1, 2H] f32  (block-diagonal layer 2)
    wv_ref,                     # [1, 2H] f32  zero on actor lanes, Wv on critic lanes
    bv_ref,                     # (1,) f32 scalar in SMEM
    out_ref,                    # [TB, 2H] slab: lanes 0:H = actor, lanes H:2H = value
):
    x = x_ref[...]                                              # bf16 operands -> MXU

    # Layer 1 (both branches in one 128-lane-wide bf16 MXU dot, f32 accumulate).
    h1 = jnp.tanh(
        jnp.dot(x, w1_ref[...], preferred_element_type=jnp.float32) + b1_ref[...]
    )                                                           # f32 [TB, 2H]

    # Layer 2 (block-diagonal => branches stay independent, still one bf16 dot).
    h2 = jnp.tanh(
        jnp.dot(h1.astype(jnp.bfloat16), w2_ref[...],
                preferred_element_type=jnp.float32) + b2_ref[...]
    )                                                           # f32 [TB, 2H]

    # Value head: VPU mul + cross-lane (XLU) reduce (wv is zero on the actor lanes).
    value = jnp.sum(h2 * wv_ref[...], axis=-1, keepdims=True) + bv_ref[0]   # [TB, 1]

    # Lane-dense packed output: actor hidden in lanes [0, H), value in lanes [H, 2H).
    h = h2.shape[1] // 2
    lane = jax.lax.broadcasted_iota(jnp.int32, h2.shape, 1)
    out_ref[...] = jnp.where(lane < h, h2, value).astype(out_ref.dtype)


# ----------------------------------------------------------------------------
# Batch-tile selection: multiple grid steps for pipelining / megacore, tile rows
# a multiple of 8, capped at block_b (kept within v7x scoped-VMEM budget).
# ----------------------------------------------------------------------------
def _pick_batch_tile(B, block_b):
    if B <= 16:
        return B                      # tiny batch: single block (tb == full dim is legal)
    tb = 8 * pl.cdiv(B, 32)           # aim for ~4 grid steps at moderate B
    tb = min(tb, block_b)             # cap tile rows for large B
    return max(8, (tb // 8) * 8)


# ----------------------------------------------------------------------------
# Wrapper: cdiv grid (no padding), weights resident in VMEM, activations streamed.
# ----------------------------------------------------------------------------
@functools.partial(jax.jit, static_argnames=("block_b", "out_dtype"))
def mlp_forward(x, fused, *, block_b=1024, out_dtype=jnp.float32):
    """x: [B, D] f32. Returns (value [B, 1], hidden_actor [B, H]) in out_dtype."""
    B, D = x.shape
    H2 = fused["w1"].shape[1]
    H = H2 // 2

    assert block_b % 8 == 0, "block_b must be a multiple of 8"
    tb = _pick_batch_tile(B, block_b)
    grid = (pl.cdiv(B, tb),)          # ragged last block handled by Pallas (no jnp.pad)

    x_bf = x.astype(jnp.bfloat16)     # halve the input stream; matches bf16 MXU operands

    const = lambda i: (0, 0)          # weights/biases: same block every step -> resident

    slab = pl.pallas_call(
        _mlp_fused_kernel,
        out_shape=jax.ShapeDtypeStruct((B, H2), out_dtype),
        grid_spec=pltpu.PrefetchScalarGridSpec(
            num_scalar_prefetch=0,
            grid=grid,
            in_specs=[
                pl.BlockSpec((tb, D), lambda i: (i, 0)),   # x tile (streamed, bf16)
                pl.BlockSpec((D, H2), const),              # fused W1 (bf16)
                pl.BlockSpec((1, H2), const),              # fused b1 (f32)
                pl.BlockSpec((H2, H2), const),             # block-diag W2 (bf16)
                pl.BlockSpec((1, H2), const),              # fused b2 (f32)
                pl.BlockSpec((1, H2), const),              # zero-padded value row (f32)
                pl.BlockSpec(memory_space=pltpu.MemorySpace.SMEM),  # bv scalar
            ],
            out_specs=pl.BlockSpec((tb, H2), lambda i: (i, 0)),
        ),
        compiler_params=pltpu.CompilerParams(
            dimension_semantics=("parallel",),
            vmem_limit_bytes=32 * 1024 * 1024,
        ),
    )(x_bf, fused["w1"], fused["b1"], fused["w2"], fused["b2"], fused["wv"], fused["bv"])

    hidden_actor = slab[:, :H]
    value = slab[:, H:H + 1]
    return value, hidden_actor


# ----------------------------------------------------------------------------
# One-time parameter fusion (lane-dense packing of the two branches).
# Weights are pre-cast to bf16 (MXU operands); biases / value row stay f32.
# ----------------------------------------------------------------------------
def fuse_params(p):
    H = p["w2a"].shape[1]
    f32, bf16 = jnp.float32, jnp.bfloat16
    w1 = jnp.concatenate([p["w1a"], p["w1c"]], axis=1).astype(bf16)    # [D, 2H]
    b1 = jnp.concatenate([p["b1a"], p["b1c"]], axis=1).astype(f32)     # [1, 2H]
    z = jnp.zeros((H, H), f32)
    w2 = jnp.concatenate(
        [jnp.concatenate([p["w2a"], z], axis=1),
         jnp.concatenate([z, p["w2c"]], axis=1)], axis=0).astype(bf16)  # [2H, 2H]
    b2 = jnp.concatenate([p["b2a"], p["b2c"]], axis=1).astype(f32)      # [1, 2H]
    wv = jnp.concatenate([jnp.zeros((1, H), f32), p["wv"].T],
                         axis=1).astype(f32)                            # [1, 2H]
    bv = p["bv"].reshape(-1).astype(f32)                                # (1,)
    return {"w1": w1, "b1": b1, "w2": w2, "b2": b2, "wv": wv, "bv": bv}


# ----------------------------------------------------------------------------
# Deterministic parameter init (orthogonal, gain sqrt(2), zero bias) matching
# the PyTorch module's init_ scheme in spirit.
# ----------------------------------------------------------------------------
def _orthogonal(key, fan_in, fan_out, gain):
    rows, cols = fan_out, fan_in
    a = jax.random.normal(key, (max(rows, cols), min(rows, cols)), dtype=jnp.float32)
    q, r = jnp.linalg.qr(a)
    q = q * jnp.sign(jnp.diag(r))
    if rows < cols:
        q = q.T
    w_pt = gain * q[:rows, :cols]               # [out, in] (PyTorch layout)
    return w_pt.T.astype(jnp.float32)           # [in, out] (kernel layout)


def init_mlp_params(key, input_size, hidden_size=64):
    gain = jnp.sqrt(2.0)
    keys = jax.random.split(key, 5)
    return {
        "w1a": _orthogonal(keys[0], input_size, hidden_size, gain),
        "b1a": jnp.zeros((1, hidden_size), jnp.float32),
        "w2a": _orthogonal(keys[1], hidden_size, hidden_size, gain),
        "b2a": jnp.zeros((1, hidden_size), jnp.float32),
        "w1c": _orthogonal(keys[2], input_size, hidden_size, gain),
        "b1c": jnp.zeros((1, hidden_size), jnp.float32),
        "w2c": _orthogonal(keys[3], hidden_size, hidden_size, gain),
        "b2c": jnp.zeros((1, hidden_size), jnp.float32),
        "wv":  _orthogonal(keys[4], hidden_size, 1, gain),
        "bv":  jnp.zeros((1, 1), jnp.float32),
    }


def mlp_reference(x, p):
    """Pure-JAX f32 reference (unfused) for correctness checking."""
    ha = jnp.tanh(x @ p["w1a"] + p["b1a"])
    ha = jnp.tanh(ha @ p["w2a"] + p["b2a"])
    hc = jnp.tanh(x @ p["w1c"] + p["b1c"])
    hc = jnp.tanh(hc @ p["w2c"] + p["b2c"])
    return hc @ p["wv"] + p["bv"], ha


if __name__ == "__main__":
    B, D, H = 2, 16, 64
    key = jax.random.PRNGKey(0)
    k_x, k_p, k_big = jax.random.split(key, 3)

    x = jax.random.normal(k_x, (B, D), dtype=jnp.float32)
    params = init_mlp_params(k_p, D, H)
    fused = fuse_params(params)

    # ---- Small-shape run (single block). ------------------------------------
    value, hidden_actor = mlp_forward(x, fused)
    jax.block_until_ready((value, hidden_actor))
    assert value.shape == (B, 1) and hidden_actor.shape == (B, H)

    # Loose check vs the true f32 reference (bf16 MXU operands => ~1e-2 error).
    v_ref, ha_ref = mlp_reference(x, params)
    assert jnp.allclose(hidden_actor, ha_ref, atol=5e-2, rtol=5e-2)
    assert jnp.allclose(value, v_ref, atol=8e-2, rtol=5e-2)

    # Tight check vs a bf16-rounded-weight/input reference.
    rb = lambda w: w.astype(jnp.bfloat16).astype(jnp.float32)
    p_bf = dict(params)
    for k in ("w1a", "w2a", "w1c", "w2c"):
        p_bf[k] = rb(params[k])
    v_sim, ha_sim = mlp_reference(rb(x), p_bf)
    assert jnp.allclose(hidden_actor, ha_sim, atol=2e-2, rtol=2e-2)
    assert jnp.allclose(value, v_sim, atol=2e-2, rtol=2e-2)

    # ---- Batch-tiled ragged-grid path (B=300 -> tb=80, 4 grid steps, no pad). -
    Bb = 300
    x_big = jax.random.normal(k_big, (Bb, D), dtype=jnp.float32)
    v_big, a_big = mlp_forward(x_big, fused)
    jax.block_until_ready((v_big, a_big))
    v_big_ref, a_big_ref = mlp_reference(x_big, params)
    assert v_big.shape == (Bb, 1) and a_big.shape == (Bb, H)
    assert jnp.allclose(a_big, a_big_ref, atol=6e-2, rtol=5e-2)
    assert jnp.allclose(v_big, v_big_ref, atol=1e-1, rtol=5e-2)

    # ---- Optional bf16 output slab (halves the dominant HBM writeback). ------
    v16, a16 = mlp_forward(x_big, fused, out_dtype=jnp.bfloat16)
    jax.block_until_ready((v16, a16))
    assert v16.dtype == jnp.bfloat16 and a16.dtype == jnp.bfloat16
    assert jnp.allclose(a16.astype(jnp.float32), a_big_ref, atol=8e-2, rtol=5e-2)
    assert jnp.allclose(v16.astype(jnp.float32), v_big_ref, atol=1.2e-1, rtol=5e-2)

    print("KERNEL_OK")
</pallas_src>

<mosaic_0001>
module attributes {stable_mosaic.version = 11 : i64} {
  func.func @_mlp_fused_kernel(%arg0: i32, %arg1: memref<2x16xbf16, #tpu.memory_space<vmem>>, %arg2: memref<16x128xbf16, #tpu.memory_space<vmem>>, %arg3: memref<1x128xf32, #tpu.memory_space<vmem>>, %arg4: memref<128x128xbf16, #tpu.memory_space<vmem>>, %arg5: memref<1x128xf32, #tpu.memory_space<vmem>>, %arg6: memref<1x128xf32, #tpu.memory_space<vmem>>, %arg7: memref<1xf32, #tpu.memory_space<smem>>, %arg8: memref<2x128xf32, #tpu.memory_space<vmem>>) attributes {dimension_semantics = [#tpu.dimension_semantics<parallel>], iteration_bounds = array<i64: 1>, scalar_prefetch = 0 : i64, scratch_operands = 0 : i64, tpu.core_type = #tpu.core_type<tc>, window_params = [{transform_indices = @transform_0, window_bounds = array<i64: 2, 16>}, {pipeline_mode = #tpu.pipeline_mode<synchronous>, transform_indices = @transform_1, window_bounds = array<i64: 16, 128>}, {pipeline_mode = #tpu.pipeline_mode<synchronous>, transform_indices = @transform_2, window_bounds = array<i64: 1, 128>}, {pipeline_mode = #tpu.pipeline_mode<synchronous>, transform_indices = @transform_3, window_bounds = array<i64: 128, 128>}, {pipeline_mode = #tpu.pipeline_mode<synchronous>, transform_indices = @transform_4, window_bounds = array<i64: 1, 128>}, {pipeline_mode = #tpu.pipeline_mode<synchronous>, transform_indices = @transform_5, window_bounds = array<i64: 1, 128>}, {transform_indices = @transform_6, window_bounds = array<i64: 1>}, {transform_indices = @transform_7, window_bounds = array<i64: 2, 128>}]} {
    %c0 = arith.constant 0 : index
    %c0_0 = arith.constant 0 : index
    %0 = vector.load %arg1[%c0, %c0_0] : memref<2x16xbf16, #tpu.memory_space<vmem>>, vector<2x16xbf16>
    %c0_1 = arith.constant 0 : index
    %c0_2 = arith.constant 0 : index
    %1 = vector.load %arg2[%c0_1, %c0_2] : memref<16x128xbf16, #tpu.memory_space<vmem>>, vector<16x128xbf16>
    %cst = arith.constant dense<0.000000e+00> : vector<2x128xf32>
    %2 = tpu.matmul %0, %1, %cst {dimension_numbers = #tpu.dot_dimension_numbers<[1], [0], [0], [1], [0, 0, 1, 1], [], []>} : vector<2x16xbf16>, vector<16x128xbf16>, vector<2x128xf32> -> vector<2x128xf32>
    %c0_3 = arith.constant 0 : index
    %c0_4 = arith.constant 0 : index
    %3 = vector.load %arg3[%c0_3, %c0_4] : memref<1x128xf32, #tpu.memory_space<vmem>>, vector<1x128xf32>
    %4 = vector.broadcast %3 : vector<1x128xf32> to vector<2x128xf32>
    %5 = arith.addf %2, %4 : vector<2x128xf32>
    %6 = math.tanh %5 : vector<2x128xf32>
    %7 = arith.truncf %6 : vector<2x128xf32> to vector<2x128xbf16>
    %c0_5 = arith.constant 0 : index
    %c0_6 = arith.constant 0 : index
    %8 = vector.load %arg4[%c0_5, %c0_6] : memref<128x128xbf16, #tpu.memory_space<vmem>>, vector<128x128xbf16>
    %cst_7 = arith.constant dense<0.000000e+00> : vector<2x128xf32>
    %9 = tpu.matmul %7, %8, %cst_7 {dimension_numbers = #tpu.dot_dimension_numbers<[1], [0], [0], [1], [0, 0, 1, 1], [], []>} : vector<2x128xbf16>, vector<128x128xbf16>, vector<2x128xf32> -> vector<2x128xf32>
    %c0_8 = arith.constant 0 : index
    %c0_9 = arith.constant 0 : index
    %10 = vector.load %arg5[%c0_8, %c0_9] : memref<1x128xf32, #tpu.memory_space<vmem>>, vector<1x128xf32>
    %11 = vector.broadcast %10 : vector<1x128xf32> to vector<2x128xf32>
    %12 = arith.addf %9, %11 : vector<2x128xf32>
    %13 = math.tanh %12 : vector<2x128xf32>
    %c0_10 = arith.constant 0 : index
    %c0_11 = arith.constant 0 : index
    %14 = vector.load %arg6[%c0_10, %c0_11] : memref<1x128xf32, #tpu.memory_space<vmem>>, vector<1x128xf32>
    %15 = vector.broadcast %14 : vector<1x128xf32> to vector<2x128xf32>
    %16 = arith.mulf %13, %15 : vector<2x128xf32>
    %cst_12 = arith.constant dense<0.000000e+00> : vector<2xf32>
    %17 = vector.multi_reduction <add>, %16, %cst_12 [1] : vector<2x128xf32> to vector<2xf32>
    %18 = vector.shape_cast %17 : vector<2xf32> to vector<2x1xf32>
    %c0_13 = arith.constant 0 : index
    %19 = memref.load %arg7[%c0_13] : memref<1xf32, #tpu.memory_space<smem>>
    %20 = vector.broadcast %19 : f32 to vector<2x1xf32>
    %21 = arith.addf %18, %20 : vector<2x1xf32>
    %22 = tpu.iota {dimensions = array<i32: 1>} : vector<2x128xi32>
    %c64_i32 = arith.constant 64 : i32
    %23 = vector.broadcast %c64_i32 : i32 to vector<2x128xi32>
    %24 = arith.cmpi slt, %22, %23 : vector<2x128xi32>
    %25 = vector.shape_cast %21 : vector<2x1xf32> to vector<2x1xf32>
    %26 = vector.broadcast %25 : vector<2x1xf32> to vector<2x128xf32>
    %27 = arith.select %24, %13, %26 : vector<2x128xi1>, vector<2x128xf32>
    %c0_14 = arith.constant 0 : index
    %c0_15 = arith.constant 0 : index
    %28 = vector.load %arg8[%c0_14, %c0_15] : memref<2x128xf32, #tpu.memory_space<vmem>>, vector<2x128xf32>
    tpu.vector_store %arg8[%c0_14, %c0_15], %27 {strides = array<i32>} : memref<2x128xf32, #tpu.memory_space<vmem>>, vector<2x128xf32>,
    return
  }
  func.func @transform_0(%arg0: i32) -> (i32, i32) {
    %c0_i32 = arith.constant 0 : i32
    %c0_i32_0 = arith.constant 0 : i32
    return %arg0, %c0_i32 : i32, i32
  }
  func.func @transform_1(%arg0: i32) -> (i32, i32) {
    %c0_i32 = arith.constant 0 : i32
    %c0_i32_0 = arith.constant 0 : i32
    %c0_i32_1 = arith.constant 0 : i32
    return %c0_i32, %c0_i32_0 : i32, i32
  }
  func.func @transform_2(%arg0: i32) -> (i32, i32) {
    %c0_i32 = arith.constant 0 : i32
    %c0_i32_0 = arith.constant 0 : i32
    %c0_i32_1 = arith.constant 0 : i32
    return %c0_i32, %c0_i32_0 : i32, i32
  }
  func.func @transform_3(%arg0: i32) -> (i32, i32) {
    %c0_i32 = arith.constant 0 : i32
    %c0_i32_0 = arith.constant 0 : i32
    %c0_i32_1 = arith.constant 0 : i32
    return %c0_i32, %c0_i32_0 : i32, i32
  }
  func.func @transform_4(%arg0: i32) -> (i32, i32) {
    %c0_i32 = arith.constant 0 : i32
    %c0_i32_0 = arith.constant 0 : i32
    %c0_i32_1 = arith.constant 0 : i32
    return %c0_i32, %c0_i32_0 : i32, i32
  }
  func.func @transform_5(%arg0: i32) -> (i32, i32) {
    %c0_i32 = arith.constant 0 : i32
    %c0_i32_0 = arith.constant 0 : i32
    %c0_i32_1 = arith.constant 0 : i32
    return %c0_i32, %c0_i32_0 : i32, i32
  }
  func.func @transform_6(%arg0: i32) -> i32 {
    %c0_i32 = arith.constant 0 : i32
    %c0_i32_0 = arith.constant 0 : i32
    return %c0_i32 : i32
  }
  func.func @transform_7(%arg0: i32) -> (i32, i32) {
    %c0_i32 = arith.constant 0 : i32
    %c0_i32_0 = arith.constant 0 : i32
    return %arg0, %c0_i32 : i32, i32
  }
}

</mosaic_0001>

<bundles_post_ra>
// kernel: mlp_forward.1
= control target key start
LH: loop header
LB: loop body
LE: loop exit
PB: predicated region body
PF: predicated region fallthrough
CT: control target
= control target key end

     0   :  { %13 = vsyncpa [#allocation4], 0  ;;  %s333_s24 = smov [#allocation3]   ;;  %s411_s0 = inlined_call_operand.vmem [shape: bf16[2,16], index: 0, kind: input, shape index: {}]   ;;  %s412_s1 = inlined_call_operand.vmem [shape: bf16[16,128], index: 1, kind: input, shape index: {}]   ;;  %s413_s2 = inlined_call_operand.vmem [shape: f32[1,128], index: 2, kind: input, shape index: {}]   ;;  %s414_s3 = inlined_call_operand.hbm [shape: bf16[128,128], index: 3, kind: input, shape index: {}]   ;;  %s415_s4 = inlined_call_operand.vmem [shape: f32[1,128], index: 4, kind: input, shape index: {}]   ;;  %s416_s5 = inlined_call_operand.vmem [shape: f32[1,128], index: 5, kind: input, shape index: {}]   ;;  %s417_s6 = inlined_call_operand.<no memory space> [shape: f32[1], index: 6, kind: input, shape index: {}]   ;;  %s418_s7 = inlined_call_operand.vmem [shape: f32[2,128], index: 7, kind: output, shape index: {}]  }
   0x1   :  { %s25_s25 = sshll.u32 %s333_s24, 4  ;;  %s309_s28 = scalar_lea.hbm %s414_s3, 1024  ;;  %s26_s25 = int_to_ptr.vmem [resolvable:$true] %s25_s25 }
   0x2   :  { %p310_p0 = scmp.ne.s32.totalorder %s414_s3, %s309_s28  ;;  %p313_p1 = scmp.lt.u32.totalorder %s309_s28, %s414_s3 }
   0x4   :  { %p315_p2 = pnand %p313_p1, %p310_p0 }
   0x6   :  { %318 = shalt.err (!%p315_p2)
}
   0x7   :  { %s319_s10 = scalar_lea.vmem %s26_s25, 1024  ;;  %p324_p4 = scmp.lt.s32.totalorder %s26_s25, %s26_s25 }
   0x8   :  { %p320_p3 = scmp.ne.s32.totalorder %s26_s25, %s319_s10  ;;  %p325_p5 = scmp.lt.s32.totalorder %s319_s10, %s319_s10 }
   0xa   :  { %p326_p6 = por %p325_p5, %p324_p4 }
   0xc   :  { %p327_p7 = pnand %p326_p6, %p320_p3 }
   0xe   :  { %330 = shalt.err (!%p327_p7)
}
   0xf   :  { %s334_s11 = smov 64   ;;  %s335_s12 = smov 4  }
  0x10   :  { %31 = dma.hbm_to_vmem [thread:$0]  %s414_s3, 1024, %s26_s25, [#allocation4], %s334_s11, %s334_s11, %s335_s12  }
  0x11   :  { %331 = dma.done.wait [#allocation4], 1024  }
  0x12   :  { %332 = vsyncadd [#allocation4], 4294966272  ;;  %v336_v0 = vmov 0.0   ;;  %vm337_vm0 = vmmov 0   ;;  %v296_v1 = vld [vmem:[%s412_s1] sm:$0xff]   ;;  %vm58_vm1 = vcmask 130048   ;;  %v231_v29 = vlaneseq }
  0x13   :  { %265 = vmatprep.subr.bf16.mxu0 %v336_v0  ;;  %267 = vmatprep.mubr.msk.bf16.mxu0 %vm337_vm0, %v336_v0  ;;  %v42_v2 = vld [vmem:[%s411_s0] sm:$0x1]  ;;  %v298_v4 = vld [vmem:[#allocation3 + $0x8] sm:$0xff]   ;;  %v299_v5 = vld [vmem:[#allocation3 + $0x10] sm:$0xff]   ;;  %vm224_vm2 = vcmask 1041408   ;;  %v229_v31 = vstv %s417_s6 }
  0x14   :  { %271 = vmatprep.subr.bf16.mxu1 %v336_v0  ;;  %287 = vmatprep.mubr.msk.bf16.mxu1 %vm337_vm0, %v336_v0  ;;  %v297_v3 = vld [vmem:[#allocation3] sm:$0xff]   ;;  %v300_v6 = vld [vmem:[#allocation3 + $0x18] sm:$0xff]   ;;  %v302_v8 = vld [vmem:[#allocation3 + $0x28] sm:$0xff]   ;;  %v232_v30 = vand.u32 127, %v231_v29 }
  0x15   :  { %266 = vmatpush3.bf16.msra.mxu0 %v296_v1  ;;  %272 = vmatpush3.bf16.msra.mxu1 %v297_v3  ;;  %v301_v7 = vld [vmem:[#allocation3 + $0x20] sm:$0xff]   ;;  %v303_v9 = vld [vmem:[#allocation3 + $0x30] sm:$0xff]   ;;  %v304_v10 = vld [vmem:[#allocation3 + $0x38] sm:$0xff]  }
  0x16   :  { %273 = vmatprep.subr.bf16.mxu1 %v336_v0  ;;  %v241_v11 = vld [vmem:[%s413_s2] ss:$0 sm:$0xff]  ;;  %vm233_vm3 = vcmp.lt.s32.totalorder %v232_v30, 64 }
  0x17   :  { %v244_v19 = vld [vmem:[%s415_s4] ss:$0 sm:$0xff] }
  0x18   :  { %268 = vmatmul.mubr.msk.bf16.vlgmr.msra.gmra.mrb[0].mxu0 %vm58_vm1, %v42_v2  ;;  %v253_v25 = vld [vmem:[%s416_s5] ss:$0 sm:$0xff] }
  0x19   :  { %274 = vmatpush3.bf16.msra.mxu1 %v298_v4 }
  0x1a   :  { %275 = vmatprep.subr.bf16.mxu1 %v336_v0 }
  0x1d   :  { %276 = vmatpush3.bf16.msra.mxu1 %v299_v5 }
  0x1e   :  { %277 = vmatprep.subr.bf16.mxu1 %v336_v0 }
  0x21   :  { %278 = vmatpush3.bf16.msra.mxu1 %v300_v6 }
  0x22   :  { %279 = vmatprep.subr.bf16.mxu1 %v336_v0 }
  0x25   :  { %280 = vmatpush3.bf16.msra.mxu1 %v301_v7 }
  0x26   :  { %281 = vmatprep.subr.bf16.mxu1 %v336_v0 }
  0x29   :  { %282 = vmatpush3.bf16.msra.mxu1 %v302_v8 }
  0x2a   :  { %283 = vmatprep.subr.bf16.mxu1 %v336_v0 }
  0x2d   :  { %284 = vmatpush3.bf16.msra.mxu1 %v303_v9 }
  0x2e   :  { %285 = vmatprep.subr.bf16.mxu1 %v336_v0 }
  0x31   :  { %286 = vmatpush3.bf16.msra.mxu1 %v304_v10 }
  0xeb   :  { %v96_v12 = vpop.f32.mrb[0].mxu0 }
  0xec   :  { %v97_v13 = vadd.f32 %v241_v11, %v96_v12  ;;  %v269_v14 = vpop.f32.mrb[1].mxu0 }
  0xed   :  { %v99_v15 = vpop.f32.mrb[2].mxu0 }
  0xee   :  { %305 = vtanh.f32 %v97_v13  ;;  %v270_v16 = vpop.f32.mrb[3].mxu0 }
  0xf8   :  { %v306_v17 = vpop.eup %305 }
  0xf9   :  { %v103_v18 = vpack.c.bf16 %v306_v17, %v306_v17 }
  0xfb   :  { %288 = vmatmul.mubr.bf16.vlgmr.msra.gmra.mrb[0].mxu1 %v103_v18 }
 0x1ce   :  { %v209_v20 = vpop.f32.mrb[0].mxu1 }
 0x1cf   :  { %v210_v21 = vadd.f32 %v244_v19, %v209_v20  ;;  %v289_v22 = vpop.f32.mrb[1].mxu1 }
 0x1d0   :  { %v212_v23 = vpop.f32.mrb[2].mxu1 }
 0x1d1   :  { %307 = vtanh.f32 %v210_v21  ;;  %v290_v24 = vpop.f32.mrb[3].mxu1 }
 0x1db   :  { %v308_v26 = vpop.eup %307 }
 0x1dc   :  { %v223_v27 = vmul.f32 %v308_v26, %v253_v25 }
 0x1de   :  { %v225_v28 = vsel %vm224_vm2, %v223_v27, 0.0 }
 0x1df   :  { %226 = vadd.xlane.f32.xlu0 %v225_v28 }
 0x26c   :  { %v227_v32 = vpop.xlane.xlu0 %226 }
 0x26d   :  { %v230_v33 = vadd.f32 %v229_v31, %v227_v32 }
 0x26f   :  { %v234_v34 = vsel %vm233_vm3, %v308_v26, %v230_v33 }
 0x270   :  { %235 = vst [vmem:[%s418_s7] sm:$0x3] %v234_v34 }
 0x271   :  { %240 = vsyncpa [#allocation4], 1 }

</bundles_post_ra>
